<compile_context>
chip_gen: v7x
topology: tpu7x:2x2x1
jax: 0.10.0
libtpu: 0.0.40
codegen_flags: <defaults>
</compile_context>

<pallas_src>
import functools

import jax
import jax.numpy as jnp
from jax import lax
from jax.experimental import pallas as pl
from jax.experimental.pallas import tpu as pltpu


def _round_up(x, m):
    return (x + m - 1) // m * m


# --------------------------------------------------------------------------
# Phase 1: time-parallel input projection  pre = x @ Wx + b_fused
# --------------------------------------------------------------------------
def input_proj_kernel(x_ref, wx_ref, b_ref, pre_ref):
    """x_ref: [Mt, I], wx_ref: [I, Np], b_ref: [1, Np], pre_ref: [Mt, Np]."""
    acc = jnp.dot(x_ref[...], wx_ref[...], preferred_element_type=jnp.float32)
    pre_ref[...] = (acc + b_ref[...]).astype(pre_ref.dtype)


# --------------------------------------------------------------------------
# Phase 2: serial recurrence over time blocks
# --------------------------------------------------------------------------
def rnn_recurrent_kernel(pre_ref, h0_ref, wh_ref, fused_ref, hT_ref, h_scratch,
                         *, t_block, batch_p, seq_len):
    """One block of Tt timesteps.

    pre_ref  : [Tt*Bp, Np]  hoisted x-projection (+bias) for this time block
    h0_ref   : [Bp, Np]     initial hidden (lanes [0:H) real, rest zero)
    wh_ref   : [Np, Np]     hidden->fused weights (rows >= H are zero)
    fused_ref: [Tt*Bp, Np]  per-step fused result (lanes [0:H)=hidden, [H:H+O)=out)
    hT_ref   : [Bp, Np]     final hidden, written once at global step T-1
    h_scratch: [Bp, Np] f32 hidden state carried across grid blocks
    """
    blk = pl.program_id(0)

    @pl.when(blk == 0)
    def _():
        h_scratch[...] = h0_ref[...].astype(jnp.float32)

    base = blk * t_block
    wh = wh_ref[...]          # hoisted: weights stay in vregs across the block

    def step(s, h):
        row = pl.multiple_of(s * batch_p, batch_p)
        # Critical path: one MXU push + one VPU add, all lane-dense (Np=128).
        acc = pre_ref[pl.ds(row, batch_p), :] + jnp.dot(
            h, wh, preferred_element_type=jnp.float32)
        fused_ref[pl.ds(row, batch_p), :] = acc.astype(fused_ref.dtype)

        @pl.when(base + s == seq_len - 1)
        def _():
            hT_ref[...] = acc.astype(hT_ref.dtype)

        return acc            # full-lane carry; padded time steps never reach hT

    h_last = lax.fori_loop(0, t_block, step, h_scratch[...], unroll=True)
    h_scratch[...] = h_last


def rnn_sequence_forward(x_seq, h0, w_i2h, b_i2h, w_i2o, b_i2o):
    """Runs the RNN cell over a whole sequence (two pallas_calls).

    x_seq: [T, B, I], h0: [B, H]
    w_i2h: [I+H, H], b_i2h: [H], w_i2o: [I+H, O], b_i2o: [O]
    Returns (outputs [T, B, O], final hidden [B, H]).
    """
    T, B, I = x_seq.shape
    H = w_i2h.shape[1]
    O = w_i2o.shape[1]
    dtype = x_seq.dtype

    Bp = _round_up(max(B, 8), 8)          # fill the f32 sublane group
    Np = _round_up(H + O, 128)            # lane-dense fused width
    Tt = min(T, 32)                       # time-block size (amortize grid cost)
    Tp = _round_up(T, Tt)
    n_blocks = Tp // Tt
    Mt = Tt * Bp                          # rows per block in flattened layout

    # Fuse the two projections column-wise (lanes [0:H)=hidden, [H:H+O)=output),
    # pad N to a 128-lane multiple, split along K into input / hidden parts, and
    # zero-pad Wh rows to Np so the carried hidden can stay full-lane.
    w_fused = jnp.concatenate([w_i2h, w_i2o], axis=1)           # [I+H, H+O]
    w_fused = jnp.pad(w_fused, ((0, 0), (0, Np - (H + O))))     # [I+H, Np]
    wx = w_fused[:I]                                            # [I, Np]
    wh = jnp.pad(w_fused[I:], ((0, Np - H), (0, 0)))            # [Np, Np]
    b_fused = jnp.pad(jnp.concatenate([b_i2h, b_i2o]),
                      (0, Np - (H + O))).reshape(1, Np)         # [1, Np]

    # Zero-padded time / batch; padded rows and lanes never contaminate real ones.
    x_pad = jnp.pad(x_seq, ((0, Tp - T), (0, Bp - B), (0, 0)))  # [Tp, Bp, I]
    x_flat = x_pad.reshape(Tp * Bp, I)
    h0_pad = jnp.pad(h0, ((0, Bp - B), (0, Np - H)))            # [Bp, Np]

    # ---- Phase 1: one big, time-parallel input projection -------------------
    pre = pl.pallas_call(
        input_proj_kernel,
        out_shape=jax.ShapeDtypeStruct((Tp * Bp, Np), jnp.float32),
        grid_spec=pltpu.PrefetchScalarGridSpec(
            num_scalar_prefetch=0,
            grid=(n_blocks,),
            in_specs=[
                pl.BlockSpec((Mt, I), lambda i: (i, 0)),   # x rows, per block
                pl.BlockSpec((I, Np), lambda i: (0, 0)),   # wx, resident
                pl.BlockSpec((1, Np), lambda i: (0, 0)),   # bias row, resident
            ],
            out_specs=pl.BlockSpec((Mt, Np), lambda i: (i, 0)),
        ),
        compiler_params=pltpu.CompilerParams(
            dimension_semantics=("parallel",)),
    )(x_flat, wx, b_fused)

    # ---- Phase 2: serial recurrence, weights VMEM-resident -------------------
    kernel = functools.partial(rnn_recurrent_kernel,
                               t_block=Tt, batch_p=Bp, seq_len=T)
    fused_flat, hT = pl.pallas_call(
        kernel,
        out_shape=(jax.ShapeDtypeStruct((Tp * Bp, Np), dtype),
                   jax.ShapeDtypeStruct((Bp, Np), dtype)),
        grid_spec=pltpu.PrefetchScalarGridSpec(
            num_scalar_prefetch=0,
            grid=(n_blocks,),
            in_specs=[
                pl.BlockSpec((Mt, Np), lambda b: (b, 0)),  # pre, per time block
                pl.BlockSpec((Bp, Np), lambda b: (0, 0)),  # h0, resident
                pl.BlockSpec((Np, Np), lambda b: (0, 0)),  # wh, resident
            ],
            out_specs=[
                pl.BlockSpec((Mt, Np), lambda b: (b, 0)),  # fused per-step slab
                pl.BlockSpec((Bp, Np), lambda b: (0, 0)),  # final hidden
            ],
            scratch_shapes=[pltpu.VMEM((Bp, Np), jnp.float32)],
        ),
        compiler_params=pltpu.CompilerParams(
            dimension_semantics=("arbitrary",)),           # time carries state
    )(pre, h0_pad, wh)

    fused = fused_flat.reshape(Tp, Bp, Np)
    outputs = fused[:T, :B, H:H + O]      # [T, B, O]
    hidden = hT[:B, :H]                   # [B, H]
    return outputs, hidden


def rnn_forward(x, h, w_i2h, b_i2h, w_i2o, b_i2o):
    """Single cell step: identical semantics to RNN.forward(input, hidden)."""
    outputs, hidden = rnn_sequence_forward(
        x[None], h, w_i2h, b_i2h, w_i2o, b_i2o)
    return outputs[0], hidden


if __name__ == "__main__":
    batch = 2
    input_size = 16
    hidden_size = 32
    output_size = 8
    seq_len = 8

    key = jax.random.PRNGKey(0)
    kx, kw1, kb1, kw2, kb2 = jax.random.split(key, 5)

    x_seq = jax.random.normal(kx, (seq_len, batch, input_size),
                              dtype=jnp.float32)
    h0 = jnp.zeros((batch, hidden_size), dtype=jnp.float32)   # initHidden()

    # Deterministic synthetic parameters (nn.Linear shapes, stored in-major).
    w_i2h = jax.random.normal(
        kw1, (input_size + hidden_size, hidden_size), dtype=jnp.float32) * 0.1
    b_i2h = jax.random.normal(kb1, (hidden_size,), dtype=jnp.float32) * 0.1
    w_i2o = jax.random.normal(
        kw2, (input_size + hidden_size, output_size), dtype=jnp.float32) * 0.1
    b_i2o = jax.random.normal(kb2, (output_size,), dtype=jnp.float32) * 0.1

    # --- single cell step (== the module's forward) --------------------------
    out1, hid1 = jax.jit(rnn_forward)(x_seq[0], h0, w_i2h, b_i2h, w_i2o, b_i2o)
    jax.block_until_ready((out1, hid1))

    combined = jnp.concatenate([x_seq[0], h0], axis=1)
    ref_hid1 = combined @ w_i2h + b_i2h
    ref_out1 = combined @ w_i2o + b_i2o
    assert out1.shape == (batch, output_size)
    assert hid1.shape == (batch, hidden_size)
    assert jnp.allclose(out1, ref_out1, atol=1e-5), "single-step output mismatch"
    assert jnp.allclose(hid1, ref_hid1, atol=1e-5), "single-step hidden mismatch"

    # --- full sequence (hoisted x-projection + blocked recurrence) -----------
    out_seq, hid_T = jax.jit(rnn_sequence_forward)(
        x_seq, h0, w_i2h, b_i2h, w_i2o, b_i2o)
    jax.block_until_ready((out_seq, hid_T))

    ref_h = h0
    ref_outs = []
    for t in range(seq_len):
        comb = jnp.concatenate([x_seq[t], ref_h], axis=1)
        ref_outs.append(comb @ w_i2o + b_i2o)
        ref_h = comb @ w_i2h + b_i2h
    ref_outs = jnp.stack(ref_outs)

    assert out_seq.shape == (seq_len, batch, output_size)
    assert hid_T.shape == (batch, hidden_size)
    assert jnp.allclose(out_seq, ref_outs, atol=1e-5), "sequence output mismatch"
    assert jnp.allclose(hid_T, ref_h, atol=1e-5), "sequence hidden mismatch"

    print("KERNEL_OK")
</pallas_src>

<mosaic_0001>
module attributes {stable_mosaic.version = 11 : i64} {
  func.func @input_proj_kernel(%arg0: i32, %arg1: memref<8x16xf32, #tpu.memory_space<vmem>>, %arg2: memref<16x128xf32, #tpu.memory_space<vmem>>, %arg3: memref<1x128xf32, #tpu.memory_space<vmem>>, %arg4: memref<8x128xf32, #tpu.memory_space<vmem>>) attributes {dimension_semantics = [#tpu.dimension_semantics<parallel>], iteration_bounds = array<i64: 1>, scalar_prefetch = 0 : i64, scratch_operands = 0 : i64, tpu.core_type = #tpu.core_type<tc>, window_params = [{transform_indices = @transform_0, window_bounds = array<i64: 8, 16>}, {pipeline_mode = #tpu.pipeline_mode<synchronous>, transform_indices = @transform_1, window_bounds = array<i64: 16, 128>}, {pipeline_mode = #tpu.pipeline_mode<synchronous>, transform_indices = @transform_2, window_bounds = array<i64: 1, 128>}, {transform_indices = @transform_3, window_bounds = array<i64: 8, 128>}]} {
    %c0 = arith.constant 0 : index
    %c0_0 = arith.constant 0 : index
    %0 = vector.load %arg1[%c0, %c0_0] : memref<8x16xf32, #tpu.memory_space<vmem>>, vector<8x16xf32>
    %c0_1 = arith.constant 0 : index
    %c0_2 = arith.constant 0 : index
    %1 = vector.load %arg2[%c0_1, %c0_2] : memref<16x128xf32, #tpu.memory_space<vmem>>, vector<16x128xf32>
    %cst = arith.constant dense<0.000000e+00> : vector<8x128xf32>
    %2 = tpu.matmul %0, %1, %cst {dimension_numbers = #tpu.dot_dimension_numbers<[1], [0], [0], [1], [0, 0, 1, 1], [], []>} : vector<8x16xf32>, vector<16x128xf32>, vector<8x128xf32> -> vector<8x128xf32>
    %c0_3 = arith.constant 0 : index
    %c0_4 = arith.constant 0 : index
    %3 = vector.load %arg3[%c0_3, %c0_4] : memref<1x128xf32, #tpu.memory_space<vmem>>, vector<1x128xf32>
    %4 = vector.broadcast %3 : vector<1x128xf32> to vector<8x128xf32>
    %5 = arith.addf %2, %4 : vector<8x128xf32>
    %c0_5 = arith.constant 0 : index
    %c0_6 = arith.constant 0 : index
    %6 = vector.load %arg4[%c0_5, %c0_6] : memref<8x128xf32, #tpu.memory_space<vmem>>, vector<8x128xf32>
    tpu.vector_store %arg4[%c0_5, %c0_6], %5 {strides = array<i32>} : memref<8x128xf32, #tpu.memory_space<vmem>>, vector<8x128xf32>,
    return
  }
  func.func @transform_0(%arg0: i32) -> (i32, i32) {
    %c0_i32 = arith.constant 0 : i32
    %c0_i32_0 = arith.constant 0 : i32
    return %arg0, %c0_i32 : i32, i32
  }
  func.func @transform_1(%arg0: i32) -> (i32, i32) {
    %c0_i32 = arith.constant 0 : i32
    %c0_i32_0 = arith.constant 0 : i32
    %c0_i32_1 = arith.constant 0 : i32
    return %c0_i32, %c0_i32_0 : i32, i32
  }
  func.func @transform_2(%arg0: i32) -> (i32, i32) {
    %c0_i32 = arith.constant 0 : i32
    %c0_i32_0 = arith.constant 0 : i32
    %c0_i32_1 = arith.constant 0 : i32
    return %c0_i32, %c0_i32_0 : i32, i32
  }
  func.func @transform_3(%arg0: i32) -> (i32, i32) {
    %c0_i32 = arith.constant 0 : i32
    %c0_i32_0 = arith.constant 0 : i32
    return %arg0, %c0_i32 : i32, i32
  }
}

module attributes {stable_mosaic.version = 11 : i64} {
  func.func @rnn_recurrent_kernel(%arg0: i32, %arg1: memref<8x128xf32, #tpu.memory_space<vmem>>, %arg2: memref<8x128xf32, #tpu.memory_space<vmem>>, %arg3: memref<128x128xf32, #tpu.memory_space<vmem>>, %arg4: memref<8x128xf32, #tpu.memory_space<vmem>>, %arg5: memref<8x128xf32, #tpu.memory_space<vmem>>, %arg6: memref<8x128xf32, #tpu.memory_space<vmem>>) attributes {dimension_semantics = [#tpu.dimension_semantics<arbitrary>], iteration_bounds = array<i64: 1>, scalar_prefetch = 0 : i64, scratch_operands = 1 : i64, tpu.core_type = #tpu.core_type<tc>, window_params = [{transform_indices = @transform_0, window_bounds = array<i64: 8, 128>}, {pipeline_mode = #tpu.pipeline_mode<synchronous>, transform_indices = @transform_1, window_bounds = array<i64: 8, 128>}, {pipeline_mode = #tpu.pipeline_mode<synchronous>, transform_indices = @transform_2, window_bounds = array<i64: 128, 128>}, {transform_indices = @transform_3, window_bounds = array<i64: 8, 128>}, {pipeline_mode = #tpu.pipeline_mode<synchronous>, transform_indices = @transform_4, window_bounds = array<i64: 8, 128>}]} {
    %c0_i32 = arith.constant 0 : i32
    %0 = arith.cmpi eq, %arg0, %c0_i32 : i32
    %1 = arith.extui %0 : i1 to i32
    %c0_i32_0 = arith.constant 0 : i32
    %2 = arith.cmpi ne, %1, %c0_i32_0 : i32
    scf.if %2 {
      %c0_12 = arith.constant 0 : index
      %c0_13 = arith.constant 0 : index
      %19 = vector.load %arg2[%c0_12, %c0_13] : memref<8x128xf32, #tpu.memory_space<vmem>>, vector<8x128xf32>
      %c0_14 = arith.constant 0 : index
      %c0_15 = arith.constant 0 : index
      %20 = vector.load %arg6[%c0_14, %c0_15] : memref<8x128xf32, #tpu.memory_space<vmem>>, vector<8x128xf32>
      tpu.vector_store %arg6[%c0_14, %c0_15], %19 {strides = array<i32>} : memref<8x128xf32, #tpu.memory_space<vmem>>, vector<8x128xf32>,
    } else {
    }
    %c1_i32 = arith.constant 1 : i32
    %3 = arith.muli %arg0, %c1_i32 : i32
    %c0 = arith.constant 0 : index
    %c0_1 = arith.constant 0 : index
    %4 = vector.load %arg3[%c0, %c0_1] : memref<128x128xf32, #tpu.memory_space<vmem>>, vector<128x128xf32>
    %c0_2 = arith.constant 0 : index
    %c0_3 = arith.constant 0 : index
    %5 = vector.load %arg6[%c0_2, %c0_3] : memref<8x128xf32, #tpu.memory_space<vmem>>, vector<8x128xf32>
    %c0_i32_4 = arith.constant 0 : i32
    %c8_i32 = arith.constant 8 : i32
    %6 = arith.muli %c0_i32_4, %c8_i32 : i32
    %7 = tpu.assume_multiple %6, 8 : i32
    %8 = arith.index_cast %7 : i32 to index
    %c0_5 = arith.constant 0 : index
    %9 = vector.load %arg1[%8, %c0_5] : memref<8x128xf32, #tpu.memory_space<vmem>>, vector<8x128xf32>
    %cst = arith.constant dense<0.000000e+00> : vector<8x128xf32>
    %10 = tpu.matmul %5, %4, %cst {dimension_numbers = #tpu.dot_dimension_numbers<[1], [0], [0], [1], [0, 0, 1, 1], [], []>} : vector<8x128xf32>, vector<128x128xf32>, vector<8x128xf32> -> vector<8x128xf32>
    %11 = arith.addf %9, %10 : vector<8x128xf32>
    %12 = arith.index_cast %7 : i32 to index
    %c0_6 = arith.constant 0 : index
    %13 = vector.load %arg4[%12, %c0_6] : memref<8x128xf32, #tpu.memory_space<vmem>>, vector<8x128xf32>
    tpu.vector_store %arg4[%12, %c0_6], %11 {strides = array<i32>} : memref<8x128xf32, #tpu.memory_space<vmem>>, vector<8x128xf32>,
    %14 = arith.addi %3, %c0_i32_4 : i32
    %c0_i32_7 = arith.constant 0 : i32
    %15 = arith.cmpi eq, %14, %c0_i32_7 : i32
    %16 = arith.extui %15 : i1 to i32
    %c0_i32_8 = arith.constant 0 : i32
    %17 = arith.cmpi ne, %16, %c0_i32_8 : i32
    scf.if %17 {
      %c0_12 = arith.constant 0 : index
      %c0_13 = arith.constant 0 : index
      %19 = vector.load %arg5[%c0_12, %c0_13] : memref<8x128xf32, #tpu.memory_space<vmem>>, vector<8x128xf32>
      tpu.vector_store %arg5[%c0_12, %c0_13], %11 {strides = array<i32>} : memref<8x128xf32, #tpu.memory_space<vmem>>, vector<8x128xf32>,
    } else {
    }
    %c1_i32_9 = arith.constant 1 : i32
    %c0_10 = arith.constant 0 : index
    %c0_11 = arith.constant 0 : index
    %18 = vector.load %arg6[%c0_10, %c0_11] : memref<8x128xf32, #tpu.memory_space<vmem>>, vector<8x128xf32>
    tpu.vector_store %arg6[%c0_10, %c0_11], %11 {strides = array<i32>} : memref<8x128xf32, #tpu.memory_space<vmem>>, vector<8x128xf32>,
    return
  }
  func.func @transform_0(%arg0: i32) -> (i32, i32) {
    %c0_i32 = arith.constant 0 : i32
    %c0_i32_0 = arith.constant 0 : i32
    return %arg0, %c0_i32 : i32, i32
  }
  func.func @transform_1(%arg0: i32) -> (i32, i32) {
    %c0_i32 = arith.constant 0 : i32
    %c0_i32_0 = arith.constant 0 : i32
    %c0_i32_1 = arith.constant 0 : i32
    return %c0_i32, %c0_i32_0 : i32, i32
  }
  func.func @transform_2(%arg0: i32) -> (i32, i32) {
    %c0_i32 = arith.constant 0 : i32
    %c0_i32_0 = arith.constant 0 : i32
    %c0_i32_1 = arith.constant 0 : i32
    return %c0_i32, %c0_i32_0 : i32, i32
  }
  func.func @transform_3(%arg0: i32) -> (i32, i32) {
    %c0_i32 = arith.constant 0 : i32
    %c0_i32_0 = arith.constant 0 : i32
    return %arg0, %c0_i32 : i32, i32
  }
  func.func @transform_4(%arg0: i32) -> (i32, i32) {
    %c0_i32 = arith.constant 0 : i32
    %c0_i32_0 = arith.constant 0 : i32
    %c0_i32_1 = arith.constant 0 : i32
    return %c0_i32, %c0_i32_0 : i32, i32
  }
}

</mosaic_0001>

<bundles_post_ra>
// kernel: rnn_forward.2
= control target key start
LH: loop header
LB: loop body
LE: loop exit
PB: predicated region body
PF: predicated region fallthrough
CT: control target
= control target key end

     0   :  { %v121_v0 = vmov 0.0|0.0   ;;  %vm122_vm0 = vmmov 0   ;;  %v123_v3 = vmov 0.0   ;;  %vm24_vm1 = vcmask 130048   ;;  %s159_s1 = inlined_call_operand.vmem [shape: f32[16,128], index: 1, kind: input, shape index: {}]   ;;  %s160_s0 = inlined_call_operand.vmem [shape: f32[8,16], index: 0, kind: input, shape index: {}]   ;;  %s161_s2 = inlined_call_operand.vmem [shape: f32[1,128], index: 2, kind: input, shape index: {}]   ;;  %s162_s3 = inlined_call_operand.vmem [shape: f32[8,128], index: 3, kind: output, shape index: {}]  }
   0x1   :  { %115 = vmatprep.subr.bf16.mxu0 %v121_v0  ;;  %v15_v1 = vld [vmem:[%s159_s1] sm:$0xff]  ;;  %v16_v2 = vld [vmem:[%s159_s1 + $0x8] sm:$0xff]  ;;  %112 = vmatprep.mubr.msk.f32.mxu0 %vm122_vm0, %v123_v3 }
   0x2   :  { %v116_v4 = vpack.c.bf16 %v16_v2, %v15_v1  ;;  %v14_v5 = vld [vmem:[%s160_s0] sm:$0xff] }
   0x3   :  { %v103_v6 = vld [vmem:[%s161_s2] ss:$0 sm:$0xff] }
   0x4   :  { %117 = vmatpush3.bf16.msra.mxu0 %v116_v4 }
   0x7   :  { %113 = vmatmul.mubr.msk.f32.vlgmr.msra.gmra.mrb[0].mxu0 %vm24_vm1, %v14_v5 }
  0xda   :  { %v94_v7 = vpop.f32.mrb[0].mxu0 }
  0xdb   :  { %v95_v8 = vadd.f32 %v103_v6, %v94_v7  ;;  %v114_v9 = vpop.f32.mrb[1].mxu0 }
  0xdd   :  { %98 = vst [vmem:[%s162_s3] sm:$0xff] %v95_v8 }

// kernel: rnn_forward.3
= control target key start
LH: loop header
LB: loop body
LE: loop exit
PB: predicated region body
PF: predicated region fallthrough
CT: control target
= control target key end

     0   :  { %v204_v0 = vmov 0.0|0.0   ;;  %vm205_vm0 = vmmov 0   ;;  %v206_v4 = vmov 0.0   ;;  %s292_s2 = inlined_call_operand.vmem [shape: f32[128,128], index: 2, kind: input, shape index: {}]   ;;  %s293_s1 = inlined_call_operand.vmem [shape: f32[8,128], index: 1, kind: input, shape index: {}]   ;;  %s294_s0 = inlined_call_operand.vmem [shape: f32[8,128], index: 0, kind: input, shape index: {}]   ;;  %s295_s3 = inlined_call_operand.vmem [shape: f32[8,128], index: 3, kind: output, shape index: {0}]   ;;  %s296_s4 = inlined_call_operand.vmem [shape: f32[8,128], index: 4, kind: output, shape index: {1}]  }
   0x1   :  { %177 = vmatprep.subr.bf16.mxu0 %v204_v0  ;;  %v22_v1 = vld [vmem:[%s292_s2] sm:$0xff]  ;;  %v23_v2 = vld [vmem:[%s292_s2 + $0x8] sm:$0xff]  ;;  %v24_v3 = vld [vmem:[%s292_s2 + $0x10] sm:$0xff]  ;;  %174 = vmatprep.mubr.msk.f32.mxu0 %vm205_vm0, %v206_v4 }
   0x2   :  { %v178_v5 = vpack.c.bf16 %v23_v2, %v22_v1  ;;  %v25_v6 = vld [vmem:[%s292_s2 + $0x18] sm:$0xff]  ;;  %v26_v8 = vld [vmem:[%s292_s2 + $0x20] sm:$0xff]  ;;  %v27_v9 = vld [vmem:[%s292_s2 + $0x28] sm:$0xff] }
   0x3   :  { %v181_v7 = vpack.c.bf16 %v25_v6, %v24_v3  ;;  %v184_v10 = vpack.c.bf16 %v27_v9, %v26_v8  ;;  %v28_v11 = vld [vmem:[%s292_s2 + $0x30] sm:$0xff]  ;;  %v29_v12 = vld [vmem:[%s292_s2 + $0x38] sm:$0xff]  ;;  %v30_v14 = vld [vmem:[%s292_s2 + $0x40] sm:$0xff] }
   0x4   :  { %179 = vmatpush3.bf16.msra.mxu0 %v178_v5  ;;  %v187_v13 = vpack.c.bf16 %v29_v12, %v28_v11  ;;  %v31_v15 = vld [vmem:[%s292_s2 + $0x48] sm:$0xff]  ;;  %v32_v17 = vld [vmem:[%s292_s2 + $0x50] sm:$0xff]  ;;  %v33_v18 = vld [vmem:[%s292_s2 + $0x58] sm:$0xff] }
   0x5   :  { %180 = vmatprep.subr.bf16.mxu0 %v204_v0  ;;  %v190_v16 = vpack.c.bf16 %v31_v15, %v30_v14  ;;  %v193_v19 = vpack.c.bf16 %v33_v18, %v32_v17  ;;  %v34_v20 = vld [vmem:[%s292_s2 + $0x60] sm:$0xff]  ;;  %v35_v21 = vld [vmem:[%s292_s2 + $0x68] sm:$0xff]  ;;  %v36_v23 = vld [vmem:[%s292_s2 + $0x70] sm:$0xff] }
   0x6   :  { %v196_v22 = vpack.c.bf16 %v35_v21, %v34_v20  ;;  %v37_v24 = vld [vmem:[%s292_s2 + $0x78] sm:$0xff]  ;;  %v20_v26 = vld [vmem:[%s293_s1] sm:$0xff] }
   0x7   :  { %v199_v25 = vpack.c.bf16 %v37_v24, %v36_v23  ;;  %v39_v27 = vld [vmem:[%s294_s0] sm:$0xff] }
   0x8   :  { %182 = vmatpush3.bf16.msra.mxu0 %v181_v7 }
   0x9   :  { %183 = vmatprep.subr.bf16.mxu0 %v204_v0 }
   0xc   :  { %185 = vmatpush3.bf16.msra.mxu0 %v184_v10 }
   0xd   :  { %186 = vmatprep.subr.bf16.mxu0 %v204_v0 }
  0x10   :  { %188 = vmatpush3.bf16.msra.mxu0 %v187_v13 }
  0x11   :  { %189 = vmatprep.subr.bf16.mxu0 %v204_v0 }
  0x14   :  { %191 = vmatpush3.bf16.msra.mxu0 %v190_v16 }
  0x15   :  { %192 = vmatprep.subr.bf16.mxu0 %v204_v0 }
  0x18   :  { %194 = vmatpush3.bf16.msra.mxu0 %v193_v19 }
  0x19   :  { %195 = vmatprep.subr.bf16.mxu0 %v204_v0 }
  0x1c   :  { %197 = vmatpush3.bf16.msra.mxu0 %v196_v22 }
  0x1d   :  { %198 = vmatprep.subr.bf16.mxu0 %v204_v0 }
  0x20   :  { %200 = vmatpush3.bf16.msra.mxu0 %v199_v25 }
  0x23   :  { %175 = vmatmul.mubr.f32.vlgmr.msra.gmra.mrb[0].mxu0 %v20_v26 }
  0xf6   :  { %v106_v28 = vpop.f32.mrb[0].mxu0 }
  0xf7   :  { %v110_v29 = vadd.f32 %v106_v28, %v39_v27  ;;  %v176_v30 = vpop.f32.mrb[1].mxu0 }
  0xf9   :  { %111 = vst [vmem:[%s295_s3] sm:$0xff] %v110_v29  ;;  %115 = vst [vmem:[%s296_s4] sm:$0xff] %v110_v29 }

</bundles_post_ra>
